<compile_context>
chip_gen: v7x
topology: tpu7x:2x2x1
jax: 0.10.0
libtpu: 0.0.40
codegen_flags: <defaults>
</compile_context>

<pallas_src>
import functools
import math

import jax
import jax.numpy as jnp
from jax.experimental import pallas as pl
from jax.experimental.pallas import tpu as pltpu

_LANES = 128


def _gumbel_quantize_kernel(z_ref, g_ref, w_ref, b_ref, et_ref,
                            zq_ref, ind_ref, kl_ref,
                            *, inv_tau, n_embed, hard):
    """One (batch b, pixel-tile j) grid step; pixels live on the lane axis.

    z_ref  : (C, TP)  bf16   input activations (NCHW slab, TP pixels)
    g_ref  : (N, TP)  f32    Gumbel noise
    w_ref  : (N, C)   bf16   1x1-conv weight
    b_ref  : (N, 1)   f32    1x1-conv bias
    et_ref : (D, N)   f32    codebook, transposed
    zq_ref : (D, TP)  f32    quantized output (already channels-first)
    ind_ref: (1, TP)  int32  per-pixel code index
    kl_ref : (1, TP)  f32    per-pixel KL term
    """
    # ---- 1x1 conv as an MXU matmul (bf16 operands, f32 accumulation) ----
    logits = jnp.dot(w_ref[...], z_ref[...],
                     preferred_element_type=jnp.float32) + b_ref[...]

    # ---- gumbel-softmax sample ----
    y = logits + g_ref[...]
    if not hard:
        y = y * inv_tau                  # argmax is scale-invariant; only the
                                         # soft weights need the temperature
    y_max = jnp.max(y, axis=0, keepdims=True)                       # (1, TP)
    iota = jax.lax.broadcasted_iota(jnp.int32, y.shape, 0)          # (N, TP)
    # first index of the column max (matches torch.argmax tie-breaking);
    # softmax is monotone so argmax(y) == argmax(softmax(y)).
    idx = jnp.min(jnp.where(y == y_max, iota, n_embed),
                  axis=0, keepdims=True)                            # (1, TP)

    if hard:
        # straight-through forward value == hard one-hot; soft weights unused.
        code = (iota == idx).astype(jnp.float32)                    # (N, TP)
    else:
        ey = jnp.exp(y - y_max)
        code = ey / jnp.sum(ey, axis=0, keepdims=True)

    # ---- z_q^T = E^T @ code  (== einsum('b n h w, n d -> b d h w')) ----
    # TODO(synk): at production sizes (n_embed=8192, C=256) replace the hard-path
    # one-hot matmul with a row gather and cast the codebook matmul to bf16.
    zq_ref[...] = jnp.dot(et_ref[...], code,
                          preferred_element_type=jnp.float32)       # (D, TP)

    # ---- KL term, log space:  sum_n qy_n * log(qy_n * N)  per pixel ----
    # log(qy*N) = logits - logZ + log N  -> one (1,TP) log, one (N,TP) exp.
    l_max = jnp.max(logits, axis=0, keepdims=True)
    el = jnp.exp(logits - l_max)
    s = jnp.sum(el, axis=0, keepdims=True)
    log_z = l_max + jnp.log(s)
    kl = jnp.sum(el * (logits - log_z + math.log(n_embed)),
                 axis=0, keepdims=True) / s                         # (1, TP)

    ind_ref[...] = idx
    kl_ref[...] = kl


def _pick_pixel_tile(hw, batch, max_tile=1024, min_grid_steps=4):
    """Largest multiple of 128 dividing H*W (capped), keeping >= min_grid_steps
    total grid steps (>= 2 per v7x TensorCore) whenever divisibility allows."""
    tp = min(max_tile, hw)
    tp -= tp % _LANES
    tp = max(tp, _LANES)
    while tp > _LANES and hw % tp:
        tp -= _LANES
    assert hw % tp == 0 and tp % _LANES == 0, "H*W must be a multiple of 128"
    while (tp > _LANES and batch * (hw // tp) < min_grid_steps
           and (tp // 2) % _LANES == 0 and hw % (tp // 2) == 0):
        tp //= 2
    return tp


def gumbel_quantize_forward(z, proj_w, proj_b, embed_w, *, seed=0, rng_key=None,
                            temp=1.0, kl_weight=5e-4, hard=True,
                            max_pixel_tile=1024):
    """Forward of GumbelQuantize (remap=None path).

    z:       (B, num_hiddens, H, W) float32 (NCHW, PyTorch convention)
    proj_w:  (n_embed, num_hiddens)   1x1 conv weight (squeezed)
    proj_b:  (n_embed,)
    embed_w: (n_embed, embedding_dim)
    returns (z_q[B, D, H, W], diff scalar, (None, None, ind[B, H, W]))
    """
    B, C, H, W = z.shape
    n_embed = proj_w.shape[0]
    D = embed_w.shape[1]
    HW = H * W
    tp = _pick_pixel_tile(HW, B, max_pixel_tile)
    n_tiles = HW // tp

    # Gumbel noise from jax.random (same layout as torch's logits: (B, N, H*W)).
    # TODO(synk): when targeting real TPUs only, move this back in-kernel with
    # pltpu.prng_seed/prng_random_bits to remove the noise HBM stream; those
    # primitives do not lower in the interpret/CPU harness.
    if rng_key is None:
        rng_key = jax.random.PRNGKey(seed)
    noise = jax.random.gumbel(rng_key, (B, n_embed, HW), jnp.float32)

    # NCHW kept end-to-end: only free reshapes, no wrapper transposes.
    z_slab = z.reshape(B, C, HW).astype(jnp.bfloat16)   # bf16 halves the z stream
    w_bf = proj_w.astype(jnp.bfloat16)                  # (N, C)
    b_col = proj_b.astype(jnp.float32).reshape(n_embed, 1)
    e_t = jnp.transpose(embed_w).astype(jnp.float32)    # (D, N): tiny, one-time

    kernel = functools.partial(_gumbel_quantize_kernel,
                               inv_tau=1.0 / float(temp),
                               n_embed=n_embed, hard=hard)

    # TODO(synk): at production sizes (n_embed=8192, C=256) additionally tile the
    # n_embed axis (flash-style running max/argmax/sum-exp), single-buffer the
    # grid-invariant operands (pipeline_mode=pl.Buffered(1)), and derive
    # vmem_limit_bytes per generation from pltpu.get_tpu_info(); unnecessary at
    # these shapes (all blocks are <= 64 KiB).
    zq, ind, kl = pl.pallas_call(
        kernel,
        out_shape=(
            jax.ShapeDtypeStruct((B, D, HW), jnp.float32),
            jax.ShapeDtypeStruct((B, 1, HW), jnp.int32),
            jax.ShapeDtypeStruct((B, 1, HW), jnp.float32),
        ),
        grid=(B, n_tiles),
        in_specs=[
            pl.BlockSpec((None, C, tp), lambda b, j: (b, 0, j)),        # z slab
            pl.BlockSpec((None, n_embed, tp), lambda b, j: (b, 0, j)),  # noise
            pl.BlockSpec((n_embed, C), lambda b, j: (0, 0)),            # proj W
            pl.BlockSpec((n_embed, 1), lambda b, j: (0, 0)),            # proj b
            pl.BlockSpec((D, n_embed), lambda b, j: (0, 0)),            # E^T
        ],
        out_specs=(
            pl.BlockSpec((None, D, tp), lambda b, j: (b, 0, j)),        # z_q
            pl.BlockSpec((None, 1, tp), lambda b, j: (b, 0, j)),        # ind
            pl.BlockSpec((None, 1, tp), lambda b, j: (b, 0, j)),        # kl
        ),
        compiler_params=pltpu.CompilerParams(
            dimension_semantics=("parallel", "parallel")),
    )(z_slab, noise, w_bf, b_col, e_t)

    z_q = zq.reshape(B, D, H, W)          # already channels-first; free reshape
    ind_out = ind.reshape(B, H, W)
    diff = kl_weight * jnp.mean(kl)       # mean over B*H*W pixels
    # TODO(synk): remap branch (remap_to_used / used-index masking) not
    # implemented; it requires an external np.load'd buffer (remap=None only).
    # TODO(synk): forward-only (no custom_vjp / straight-through backward).
    return z_q, diff, (None, None, ind_out)


if __name__ == "__main__":
    key = jax.random.PRNGKey(0)
    k_z, k_w, k_b, k_e = jax.random.split(key, 4)

    # module config (small, consistent with GumbelQuantize.__init__)
    B, num_hiddens, H, W = 2, 32, 16, 16
    n_embed, embedding_dim = 128, 16
    kl_weight = 0.0005
    seed = 1234

    z = jax.random.normal(k_z, (B, num_hiddens, H, W), jnp.float32)
    proj_w = 0.1 * jax.random.normal(k_w, (n_embed, num_hiddens), jnp.float32)
    proj_b = 0.1 * jax.random.normal(k_b, (n_embed,), jnp.float32)
    embed_w = jax.random.normal(k_e, (n_embed, embedding_dim), jnp.float32)

    # ---- hard=True (eval-mode) forward ----
    z_q, diff, (_, _, ind) = gumbel_quantize_forward(
        z, proj_w, proj_b, embed_w, seed=seed, temp=1.0,
        kl_weight=kl_weight, hard=True)
    jax.block_until_ready((z_q, diff, ind))

    assert z_q.shape == (B, embedding_dim, H, W) and z_q.dtype == jnp.float32
    assert ind.shape == (B, H, W) and ind.dtype == jnp.int32
    assert bool(jnp.all(jnp.isfinite(z_q))) and bool(jnp.isfinite(diff))
    assert bool(jnp.all((ind >= 0) & (ind < n_embed)))

    # hard=True forward: each z_q pixel vector must equal its selected codebook row
    zq_pix = jnp.transpose(z_q, (0, 2, 3, 1)).reshape(-1, embedding_dim)
    gathered = embed_w[ind.reshape(-1)]
    assert bool(jnp.allclose(zq_pix, gathered, rtol=2e-2, atol=2e-2))

    # KL term is noise-independent -> check against a pure-JAX f32 reference
    z_bcp = z.reshape(B, num_hiddens, H * W)
    logits_bnp = jnp.einsum('nc,bcp->bnp', proj_w, z_bcp) + proj_b[None, :, None]
    qy = jax.nn.softmax(logits_bnp, axis=1)
    kl_ref_mean = jnp.mean(jnp.sum(qy * jnp.log(qy * n_embed + 1e-10), axis=1))
    assert bool(jnp.allclose(diff / kl_weight, kl_ref_mean, rtol=5e-2, atol=1e-2))

    # ---- hard=False (soft) forward against a full reference with the same noise ----
    z_q_soft, diff_soft, (_, _, _) = gumbel_quantize_forward(
        z, proj_w, proj_b, embed_w, seed=seed, temp=1.0,
        kl_weight=kl_weight, hard=False)
    jax.block_until_ready((z_q_soft, diff_soft))
    assert bool(jnp.all(jnp.isfinite(z_q_soft))) and bool(jnp.isfinite(diff_soft))

    noise = jax.random.gumbel(jax.random.PRNGKey(seed),
                              (B, n_embed, H * W), jnp.float32)
    soft_ref = jax.nn.softmax(logits_bnp + noise, axis=1)          # temp = 1.0
    zq_soft_ref = jnp.einsum('nd,bnp->bdp', embed_w, soft_ref).reshape(
        B, embedding_dim, H, W)
    assert bool(jnp.allclose(z_q_soft, zq_soft_ref, rtol=5e-2, atol=5e-2))

    print("KERNEL_OK")
</pallas_src>

<mosaic_0001>
module attributes {stable_mosaic.version = 11 : i64} {
  func.func @_gumbel_quantize_kernel(%arg0: i32, %arg1: i32, %arg2: memref<1x32x128xbf16, #tpu.memory_space<vmem>>, %arg3: memref<1x128x128xf32, #tpu.memory_space<vmem>>, %arg4: memref<128x32xbf16, #tpu.memory_space<vmem>>, %arg5: memref<128x1xf32, #tpu.memory_space<vmem>>, %arg6: memref<16x128xf32, #tpu.memory_space<vmem>>, %arg7: memref<1x16x128xf32, #tpu.memory_space<vmem>>, %arg8: memref<1x1x128xi32, #tpu.memory_space<vmem>>, %arg9: memref<1x1x128xf32, #tpu.memory_space<vmem>>) attributes {dimension_semantics = [#tpu.dimension_semantics<parallel>, #tpu.dimension_semantics<parallel>], iteration_bounds = array<i64: 2, 2>, scalar_prefetch = 0 : i64, scratch_operands = 0 : i64, tpu.core_type = #tpu.core_type<tc>, window_params = [{transform_indices = @transform_0, window_bounds = array<i64: 1, 32, 128>}, {transform_indices = @transform_1, window_bounds = array<i64: 1, 128, 128>}, {pipeline_mode = #tpu.pipeline_mode<synchronous>, transform_indices = @transform_2, window_bounds = array<i64: 128, 32>}, {pipeline_mode = #tpu.pipeline_mode<synchronous>, transform_indices = @transform_3, window_bounds = array<i64: 128, 1>}, {pipeline_mode = #tpu.pipeline_mode<synchronous>, transform_indices = @transform_4, window_bounds = array<i64: 16, 128>}, {transform_indices = @transform_5, window_bounds = array<i64: 1, 16, 128>}, {transform_indices = @transform_6, window_bounds = array<i64: 1, 1, 128>}, {transform_indices = @transform_7, window_bounds = array<i64: 1, 1, 128>}]} {
    %c0 = arith.constant 0 : index
    %c0_0 = arith.constant 0 : index
    %0 = vector.load %arg4[%c0, %c0_0] : memref<128x32xbf16, #tpu.memory_space<vmem>>, vector<128x32xbf16>
    %c0_1 = arith.constant 0 : index
    %c0_2 = arith.constant 0 : index
    %c0_3 = arith.constant 0 : index
    %1 = vector.load %arg2[%c0_1, %c0_2, %c0_3] : memref<1x32x128xbf16, #tpu.memory_space<vmem>>, vector<1x32x128xbf16>
    %2 = vector.shape_cast %1 : vector<1x32x128xbf16> to vector<32x128xbf16>
    %cst = arith.constant dense<0.000000e+00> : vector<128x128xf32>
    %3 = tpu.matmul %0, %2, %cst {dimension_numbers = #tpu.dot_dimension_numbers<[1], [0], [0], [1], [0, 0, 1, 1], [], []>} : vector<128x32xbf16>, vector<32x128xbf16>, vector<128x128xf32> -> vector<128x128xf32>
    %c0_4 = arith.constant 0 : index
    %c0_5 = arith.constant 0 : index
    %4 = vector.load %arg5[%c0_4, %c0_5] : memref<128x1xf32, #tpu.memory_space<vmem>>, vector<128x1xf32>
    %5 = vector.broadcast %4 : vector<128x1xf32> to vector<128x128xf32>
    %6 = arith.addf %3, %5 : vector<128x128xf32>
    %c0_6 = arith.constant 0 : index
    %c0_7 = arith.constant 0 : index
    %c0_8 = arith.constant 0 : index
    %7 = vector.load %arg3[%c0_6, %c0_7, %c0_8] : memref<1x128x128xf32, #tpu.memory_space<vmem>>, vector<1x128x128xf32>
    %8 = vector.shape_cast %7 : vector<1x128x128xf32> to vector<128x128xf32>
    %9 = arith.addf %6, %8 : vector<128x128xf32>
    %cst_9 = arith.constant dense<0xFF800000> : vector<128xf32>
    %10 = vector.multi_reduction <maximumf>, %9, %cst_9 [0] : vector<128x128xf32> to vector<128xf32>
    %11 = vector.shape_cast %10 : vector<128xf32> to vector<1x128xf32>
    %12 = tpu.iota {dimensions = array<i32: 0>} : vector<128x128xi32>
    %13 = vector.broadcast %11 : vector<1x128xf32> to vector<128x128xf32>
    %14 = arith.cmpf oeq, %9, %13 : vector<128x128xf32>
    %c128_i32 = arith.constant 128 : i32
    %15 = vector.broadcast %c128_i32 : i32 to vector<128x128xi32>
    %16 = arith.select %14, %12, %15 : vector<128x128xi1>, vector<128x128xi32>
    %cst_10 = arith.constant dense<2147483647> : vector<128xi32>
    %17 = vector.multi_reduction <minsi>, %16, %cst_10 [0] : vector<128x128xi32> to vector<128xi32>
    %18 = vector.shape_cast %17 : vector<128xi32> to vector<1x128xi32>
    %19 = vector.broadcast %18 : vector<1x128xi32> to vector<128x128xi32>
    %20 = arith.cmpi eq, %12, %19 : vector<128x128xi32>
    %21 = arith.extui %20 : vector<128x128xi1> to vector<128x128xi32>
    %22 = arith.sitofp %21 : vector<128x128xi32> to vector<128x128xf32>
    %c0_11 = arith.constant 0 : index
    %c0_12 = arith.constant 0 : index
    %23 = vector.load %arg6[%c0_11, %c0_12] : memref<16x128xf32, #tpu.memory_space<vmem>>, vector<16x128xf32>
    %cst_13 = arith.constant dense<0.000000e+00> : vector<16x128xf32>
    %24 = tpu.matmul %23, %22, %cst_13 {dimension_numbers = #tpu.dot_dimension_numbers<[1], [0], [0], [1], [0, 0, 1, 1], [], []>} : vector<16x128xf32>, vector<128x128xf32>, vector<16x128xf32> -> vector<16x128xf32>
    %c0_14 = arith.constant 0 : index
    %c0_15 = arith.constant 0 : index
    %c0_16 = arith.constant 0 : index
    %25 = vector.load %arg7[%c0_14, %c0_15, %c0_16] : memref<1x16x128xf32, #tpu.memory_space<vmem>>, vector<1x16x128xf32>
    %26 = vector.shape_cast %25 : vector<1x16x128xf32> to vector<16x128xf32>
    %27 = vector.shape_cast %24 : vector<16x128xf32> to vector<1x16x128xf32>
    tpu.vector_store %arg7[%c0_14, %c0_15, %c0_16], %27 {strides = array<i32>} : memref<1x16x128xf32, #tpu.memory_space<vmem>>, vector<1x16x128xf32>,
    %cst_17 = arith.constant dense<0xFF800000> : vector<128xf32>
    %28 = vector.multi_reduction <maximumf>, %6, %cst_17 [0] : vector<128x128xf32> to vector<128xf32>
    %29 = vector.shape_cast %28 : vector<128xf32> to vector<1x128xf32>
    %30 = vector.broadcast %29 : vector<1x128xf32> to vector<128x128xf32>
    %31 = arith.subf %6, %30 : vector<128x128xf32>
    %32 = math.exp %31 : vector<128x128xf32>
    %cst_18 = arith.constant dense<0.000000e+00> : vector<128xf32>
    %33 = vector.multi_reduction <add>, %32, %cst_18 [0] : vector<128x128xf32> to vector<128xf32>
    %34 = vector.shape_cast %33 : vector<128xf32> to vector<1x128xf32>
    %35 = math.log %34 : vector<1x128xf32>
    %36 = arith.addf %29, %35 : vector<1x128xf32>
    %37 = vector.broadcast %36 : vector<1x128xf32> to vector<128x128xf32>
    %38 = arith.subf %6, %37 : vector<128x128xf32>
    %cst_19 = arith.constant 4.85203028 : f32
    %39 = vector.broadcast %cst_19 : f32 to vector<128x128xf32>
    %40 = arith.addf %38, %39 : vector<128x128xf32>
    %41 = arith.mulf %32, %40 : vector<128x128xf32>
    %cst_20 = arith.constant dense<0.000000e+00> : vector<128xf32>
    %42 = vector.multi_reduction <add>, %41, %cst_20 [0] : vector<128x128xf32> to vector<128xf32>
    %43 = vector.shape_cast %42 : vector<128xf32> to vector<1x128xf32>
    %44 = arith.divf %43, %34 : vector<1x128xf32>
    %c0_21 = arith.constant 0 : index
    %c0_22 = arith.constant 0 : index
    %c0_23 = arith.constant 0 : index
    %45 = vector.load %arg8[%c0_21, %c0_22, %c0_23] : memref<1x1x128xi32, #tpu.memory_space<vmem>>, vector<1x1x128xi32>
    %46 = vector.shape_cast %45 : vector<1x1x128xi32> to vector<1x128xi32>
    %47 = vector.shape_cast %18 : vector<1x128xi32> to vector<1x1x128xi32>
    tpu.vector_store %arg8[%c0_21, %c0_22, %c0_23], %47 {strides = array<i32>} : memref<1x1x128xi32, #tpu.memory_space<vmem>>, vector<1x1x128xi32>,
    %c0_24 = arith.constant 0 : index
    %c0_25 = arith.constant 0 : index
    %c0_26 = arith.constant 0 : index
    %48 = vector.load %arg9[%c0_24, %c0_25, %c0_26] : memref<1x1x128xf32, #tpu.memory_space<vmem>>, vector<1x1x128xf32>
    %49 = vector.shape_cast %48 : vector<1x1x128xf32> to vector<1x128xf32>
    %50 = vector.shape_cast %44 : vector<1x128xf32> to vector<1x1x128xf32>
    tpu.vector_store %arg9[%c0_24, %c0_25, %c0_26], %50 {strides = array<i32>} : memref<1x1x128xf32, #tpu.memory_space<vmem>>, vector<1x1x128xf32>,
    return
  }
  func.func @transform_0(%arg0: i32, %arg1: i32) -> (i32, i32, i32) {
    %c0_i32 = arith.constant 0 : i32
    %c0_i32_0 = arith.constant 0 : i32
    return %arg0, %c0_i32, %arg1 : i32, i32, i32
  }
  func.func @transform_1(%arg0: i32, %arg1: i32) -> (i32, i32, i32) {
    %c0_i32 = arith.constant 0 : i32
    %c0_i32_0 = arith.constant 0 : i32
    return %arg0, %c0_i32, %arg1 : i32, i32, i32
  }
  func.func @transform_2(%arg0: i32, %arg1: i32) -> (i32, i32) {
    %c0_i32 = arith.constant 0 : i32
    %c0_i32_0 = arith.constant 0 : i32
    %c0_i32_1 = arith.constant 0 : i32
    return %c0_i32, %c0_i32_0 : i32, i32
  }
  func.func @transform_3(%arg0: i32, %arg1: i32) -> (i32, i32) {
    %c0_i32 = arith.constant 0 : i32
    %c0_i32_0 = arith.constant 0 : i32
    %c0_i32_1 = arith.constant 0 : i32
    return %c0_i32, %c0_i32_0 : i32, i32
  }
  func.func @transform_4(%arg0: i32, %arg1: i32) -> (i32, i32) {
    %c0_i32 = arith.constant 0 : i32
    %c0_i32_0 = arith.constant 0 : i32
    %c0_i32_1 = arith.constant 0 : i32
    return %c0_i32, %c0_i32_0 : i32, i32
  }
  func.func @transform_5(%arg0: i32, %arg1: i32) -> (i32, i32, i32) {
    %c0_i32 = arith.constant 0 : i32
    %c0_i32_0 = arith.constant 0 : i32
    return %arg0, %c0_i32, %arg1 : i32, i32, i32
  }
  func.func @transform_6(%arg0: i32, %arg1: i32) -> (i32, i32, i32) {
    %c0_i32 = arith.constant 0 : i32
    %c0_i32_0 = arith.constant 0 : i32
    return %arg0, %c0_i32, %arg1 : i32, i32, i32
  }
  func.func @transform_7(%arg0: i32, %arg1: i32) -> (i32, i32, i32) {
    %c0_i32 = arith.constant 0 : i32
    %c0_i32_0 = arith.constant 0 : i32
    return %arg0, %c0_i32, %arg1 : i32, i32, i32
  }
}

</mosaic_0001>

<bundles_post_ra>
// kernel: tpu_custom_call.1
= control target key start
LH: loop header
LB: loop body
LE: loop exit
PB: predicated region body
PF: predicated region fallthrough
CT: control target
= control target key end

     0   :  { %s2705_s0 = inlined_call_operand.vmem [shape: bf16[2,32,256], index: 0, kind: input, shape index: {}]   ;;  %s2706_s1 = inlined_call_operand.hbm [shape: f32[2,128,256], index: 1, kind: input, shape index: {}]   ;;  %s2707_s2 = inlined_call_operand.vmem [shape: bf16[128,32], index: 2, kind: input, shape index: {}]   ;;  %s2708_s3 = inlined_call_operand.vmem [shape: f32[128,1], index: 3, kind: input, shape index: {}]   ;;  %s2709_s4 = inlined_call_operand.vmem [shape: f32[16,128], index: 4, kind: input, shape index: {}]   ;;  %s2710_s5 = inlined_call_operand.hbm [shape: f32[2,16,256], index: 5, kind: output, shape index: {0}]   ;;  %s2711_s6 = inlined_call_operand.hbm [shape: s32[2,1,256], index: 6, kind: output, shape index: {1}]   ;;  %s2712_s7 = inlined_call_operand.hbm [shape: f32[2,1,256], index: 7, kind: output, shape index: {2}]  }
   0x1   :  { %2734 = sst [smem:[#allocation30_spill]] %s2705_s0 }
   0x2   :  { %13 = vsyncpa [#allocation4], 0 }
   0x3   :  { %15 = vsyncpa [#allocation4 + $0x1], 0 }
   0x4   :  { %16 = vsyncpa [#allocation5], 0 }
   0x5   :  { %18 = vsyncpa [#allocation5 + $0x1], 0 }
   0x6   :  { %19 = vsyncpa [#allocation8], 0 }
   0x7   :  { %21 = vsyncpa [#allocation8 + $0x1], 0  ;;  %s1921_s24 = smov 0   ;;  %s1923_s25 = smov 0  }
   0x8   :  { %s1925_s26 = smov 0   ;;  %s1927_s27 = smov 0  }
   0x9   :  { %s1929_s28 = smov 0   ;;  %s1931_s29 = smov 0  }
   0xa   :  { %s1933_s30 = smov 0   ;;  %s1935_s8 = smov 0  }
   0xb LB: > { %s1962_s9 = sadd.s32 4294967295, %s1867_s8   ;;  %s2713_s10 = sadd.s32 4294967294, %s1867_s8   ;;  %s1867_s8 = sphi %s1935_s8, %s27_s8   ;;  %s1863_s30 = sphi %s1933_s30, %s2786_s30   ;;  %s1859_s29 = sphi %s1931_s29, %s2785_s29   ;;  %s1855_s28 = sphi %s1929_s28, %s2784_s28   ;;  %s1851_s27 = sphi %s1927_s27, %s2783_s27   ;;  %s1847_s26 = sphi %s1925_s26, %s2782_s26   ;;  %s1843_s25 = sphi %s1923_s25, %s2781_s25   ;;  %s1839_s24 = sphi %s1921_s24, %s2780_s24  }
   0xc   : > { %s36_s11 = sadd.s32 1, %s1859_s29  ;;  %s39_s12 = sadd.s32 1, %s1863_s30 }
   0xd   : > { %p37_p0 = scmp.ge.s32.totalorder %s36_s11, 2  ;;  %p55_p1 = scmp.ne.s32.totalorder %s1847_s26, %s1843_s25 }
   0xe   : > { %p56_p2 = scmp.eq.s32.totalorder %s1867_s8, 0  ;;  %p89_p5 = scmp.ne.s32.totalorder %s1843_s25, %s1839_s24 }
   0xf   : > { %s2788_s11 = smov (%p37_p0, %s36_s11), 0  ;;  %s2790_s12 = smov (!%p37_p0, %s39_s12), %s1863_s30 }
  0x10   : > { %2735 = sst [smem:[#allocation13_spill]] %s2788_s11  ;;  %s44_s13 = ssub.s32 %s1859_s29, %s2788_s11 }
  0x11   : > { %p1975_p3 = por %p56_p2, %p55_p1  ;;  %p41_p4 = scmp.ge.s32.totalorder %s2790_s12, 2 }
  0x12   : > { %p90_p6 = scmp.eq.s32.totalorder %s1962_s9, 0  ;;  %p178_p7 = scmp.eq.s32.totalorder %s1962_s9, 3 }
  0x13   : > { %s2792_s12 = smov (%p41_p4, %s2790_s12), 0  ;;  %p184_p10 = scmp.eq.s32.totalorder %s2713_s10, 3 }
  0x14   : > { %2737 = sst [smem:[#allocation14_spill]] %s2792_s12  ;;  %p1985_p8 = por %p90_p6, %p89_p5 }
  0x15   : > { %p1989_p9 = por %p178_p7, %p55_p1  ;;  %s43_s17 = ssub.s32 %s1863_s30, %s2792_s12 }
  0x16   : > { %s45_s18 = sor.u32 %s44_s13, %s43_s17  ;;  %s48_s19 = sadd.s32 1, %s1847_s26 }
  0x17   : > { %s2739_s16 = scalar_select %p1989_p9, 1, 0 }
  0x18   : > { %p46_p11 = scmp.eq.s32.totalorder %s45_s18, 0  ;;  %p1998_p12 = por %p184_p10, %p89_p5 }
  0x19   : > { %p1357_p13 = scmp.ge.s32.totalorder %s1867_s8, 4 }
  0x1a   : > { %s2740_s20 = scalar_select %p1998_p12, 1, 0 }
  0x1b   : > { %s2003_s21 = scalar_select %p46_p11, %s1847_s26, %s48_s19  }
  0x1c   : > { %2741 = sst [smem:[#allocation15_spill]] %s2740_s20  ;;  %265 = sbr.rel (%p1357_p13) target bundleno = 75 (0x4b), region = 28 }
  0x1d   : > { %2742 = sst [smem:[#allocation16_spill]] %s2003_s21 }
  0x23   : > { %268 = sbr.rel (!%p1975_p3) target bundleno = 47 (0x2f), region = 32  ;;  %s270_s22 = sand.u32 (%p1975_p3), 1, %s1847_s26  }
  0x24   : > { %s1359_s23 = sshll.u32 (%p1975_p3), %s1863_s30, 3  ;;  %s1358_s13 = sshll.u32 (%p1975_p3), %s270_s22, 4 }
  0x25   : > { %s274_s17 = sadd.s32 (%p1975_p3), %s1859_s29, %s1359_s23  ;;  %s2743_s0 = sld [smem:[#allocation30_spill]] (%p1975_p3) }
  0x26   : > { %s1360_s18 = sshll.u32 (%p1975_p3), %s274_s17, 2  ;;  %s272_s19 = scalar_lea.vmem (%p1975_p3), [#allocation2], %s1358_s13 }
  0x2b   : > { %s276_s11 = scalar_lea.vmem %s2743_s0, %s1360_s18 }
  0x2c   : > { %v292_v0 = vld [vmem:[%s276_s11] sm:$0xf]  ;;  %v294_v1 = vld [vmem:[%s276_s11 + $0x8] sm:$0xf]  ;;  %v296_v2 = vld [vmem:[%s276_s11 + $0x10] sm:$0xf] }
  0x2d   : > { %293 = vst [vmem:[%s272_s19] sm:$0xf] %v292_v0  ;;  %295 = vst [vmem:[%s272_s19 + $0x4] sm:$0xf] %v294_v1  ;;  %v298_v3 = vld [vmem:[%s276_s11 + $0x18] sm:$0xf] }
  0x2e   : > { %297 = vst [vmem:[%s272_s19 + $0x8] sm:$0xf] %v296_v2  ;;  %299 = vst [vmem:[%s272_s19 + $0xc] sm:$0xf] %v298_v3 }
  0x2f PF: > { %s331_s22 = sand.u32 1, %s1847_s26   ;;  %s1362_s23 = sshll.u32 %s1863_s30, 5 }
  0x30   : > { %s1361_s17 = sshll.u32 %s331_s22, 7  ;;  %s340_s21 = sadd.s32 %s1859_s29, %s1362_s23 }
  0x31   : > { %s1363_s10 = sshll.u32 %s340_s21, 7  ;;  %s335_s12 = scalar_lea.vmem [#allocation3], %s1361_s17 }
  0x32   : > { %s343_s18 = sshll.u32 %s335_s12, 4  ;;  %s2020_s13 = scalar_lea.hbm %s2706_s1, %s1363_s10  ;;  %s2022_s18 = int_to_ptr.vmem [resolvable:$true] %s343_s18 }
  0x33   : > { %s2024_s11 = scalar_lea.sflag [#allocation4], %s331_s22  ;;  %s1681_s19 = scalar_lea.hbm %s2020_s13, 2048 }
  0x34   : > { %p1682_p0 = scmp.ne.s32.totalorder %s2020_s13, %s1681_s19  ;;  %s1685_s17 = scalar_lea.hbm %s2706_s1, 8192 }
  0x35   : > { %p1686_p4 = scmp.lt.u32.totalorder %s2020_s13, %s2706_s1  ;;  %p1687_p5 = scmp.lt.u32.totalorder %s1685_s17, %s1681_s19 }
  0x36   : > { %p1683_p1 = pnand %p1682_p0, %p1975_p3  ;;  %p1689_p7 = scmp.lt.u32.totalorder %s1681_s19, %s2020_s13 }
  0x37   : > { %p1688_p6 = por %p1687_p5, %p1686_p4 }
  0x38   : > { %p1684_p2 = pneg %p1683_p1 }
  0x39   : > { %p1690_p10 = por %p1689_p7, %p1688_p6 }
  0x3b   : > { %p1691_p11 = pnand %p1690_p10, %p1684_p2 }
  0x3d   : > { %1694 = shalt.err (!%p1691_p11)
}
  0x3e   : > { %s1695_s22 = scalar_lea.vmem %s2022_s18, 2048  ;;  %s1869_s10 = smov [#allocation3]  }
  0x3f   : > { %p1696_p13 = scmp.ne.s32.totalorder %s2022_s18, %s1695_s22  ;;  %s1699_s12 = sshll.u32 %s1869_s10, 4  ;;  %s1700_s12 = int_to_ptr.vmem [resolvable:$false] %s1699_s12 }
  0x40   : > { %s1701_s21 = scalar_lea.vmem %s1700_s12, 4096  ;;  %p1702_p12 = scmp.lt.s32.totalorder %s2022_s18, %s1700_s12 }
  0x41   : > { %p1697_p0 = pnand %p1696_p13, %p1975_p3  ;;  %p1703_p9 = scmp.lt.s32.totalorder %s1701_s21, %s1695_s22 }
  0x43   : > { %p1698_p1 = pneg %p1697_p0  ;;  %p1704_p4 = por %p1703_p9, %p1702_p12 }
  0x45   : > { %p1705_p5 = pnand %p1704_p4, %p1698_p1 }
  0x47   : > { %1708 = shalt.err (!%p1705_p5)
}
  0x48   : > { %s1870_s19 = smov 256   ;;  %s1871_s23 = smov 128  }
  0x49   : > { %s1872_s17 = smov 8  }
  0x4a   : > { %1542 = dma.hbm_to_vmem [thread:$0]  (%p1975_p3), %s2020_s13, 2048, %s2022_s18, %s2024_s11, %s1870_s19, %s1871_s23, %s1872_s17  }
  0x4b PF: > { %p1364_p2 = scmp.ge.s32.totalorder %s1867_s8, 1  ;;  %p351_p6 = scmp.lt.s32.totalorder %s1867_s8, 5 }
  0x4d   : > { %p352_p7 = pnand %p1364_p2, %p351_p6 }
  0x4f   : > { %355 = sbr.rel (%p352_p7) target bundleno = 666 (0x29a), region = 77 }
  0x56   : > { %s2051_s0 = sand.u32 1, %s1843_s25  }
  0x57   : > { %s2731_s20 = sshll.u32 %s2051_s0, 4  ;;  %s1366_s22 = sshll.u32 %s2051_s0, 7 }
  0x58   : > { %s360_s14 = scalar_lea.vmem [#allocation2], %s2731_s20  ;;  %s365_s18 = scalar_lea.sflag [#allocation4], %s2051_s0 }
  0x59   : > { %s2058_s13 = scalar_lea.vmem [#allocation3], %s1366_s22 }
  0x5a   : > { %1826 = dma.done.wait (%p1985_p8), %s365_s18, 2048  }
  0x5b   : > { %1828 = vsyncadd (%p1985_p8), %s365_s18, 4294965248  ;;  %v1873_v4 = vmov 0   ;;  %v1635_v5 = vld [vmem:[%s360_s14] sm:$0xff]   ;;  %v1636_v6 = vld [vmem:[%s360_s14 + $0x8] sm:$0xff]   ;;  %vm580_vm0 = vcmask 261120   ;;  %s2732_s22 = scalar_lea.vmem [#allocation9], %s2051_s0 }
  0x5c   : > { %1634 = vset.pattern.permute.xlu1 %v1873_v4  ;;  %1633 = vset.pattern.permute.xlu0 %v1873_v4  ;;  %v1637_v7 = vld [vmem:[%s2707_s2] sm:$0xff]   ;;  %v1638_v8 = vld [vmem:[%s2707_s2 + $0x8] sm:$0xff]   ;;  %v1639_v9 = vld [vmem:[%s2707_s2 + $0x10] sm:$0xff]   ;;  %s1141_s14 = sand.u32 1, %s1962_s9   ;;  %s1421_s18 = sshll.u32 %s1855_s28, 1 }
  0x5d   : > { %1455 = vmatprep.subr.bf16.mxu0 %v1635_v5  ;;  %1459 = vmatprep.mubr.msk.bf16.mxu0 %vm580_vm0, %v1637_v7  ;;  %v434_v10 = vld [vmem:[%s2708_s3 + $0x10] sm:$0xff]  ;;  %v432_v11 = vld [vmem:[%s2708_s3] sm:$0xff]  ;;  %v435_v12 = vld [vmem:[%s2708_s3 + $0x18] sm:$0xff]  ;;  %s2582_s11 = sadd.s32 %s1851_s27, %s1421_s18  ;;  %s2594_s23 = scalar_lea.sflag [#allocation8], %s1141_s14 }
  0x5e   : > { %1456 = vmatpush3.bf16.msra.mxu0 %v1635_v5  ;;  %460 = vperm.xlu1 %1634, %v434_v10   ;;  %v433_v13 = vld [vmem:[%s2708_s3 + $0x8] sm:$0xff]  ;;  %v1640_v14 = vld [vmem:[%s2707_s2 + $0x18] sm:$0xff]   ;;  %v1641_v15 = vld [vmem:[%s2707_s2 + $0x20] sm:$0xff]   ;;  %s2733_s12 = sshll.u32 %s2582_s11, 4  ;;  %p2770_p8 = scmp.ne.s32.totalorder %s2739_s16, 0 }
  0x5f   : > { %1457 = vmatprep.subr.bf16.mxu0 %v1636_v6  ;;  %450 = vperm.xlu0 %1633, %v432_v11   ;;  %v437_v16 = vld [vmem:[%s2708_s3 + $0x28] sm:$0xff]  ;;  %v436_v17 = vld [vmem:[%s2708_s3 + $0x20] sm:$0xff]  ;;  %v439_v18 = vld [vmem:[%s2708_s3 + $0x38] sm:$0xff]  ;;  %s1175_s19 = scalar_lea.hbm %s2711_s6, %s2733_s12  ;;  %s1875_s17 = smov [#allocation7]  }
  0x60   : > { %v438_v19 = vld [vmem:[%s2708_s3 + $0x30] sm:$0xff]  ;;  %v1642_v20 = vld [vmem:[%s2707_s2 + $0x28] sm:$0xff]   ;;  %v440_v23 = vld [vmem:[%s2708_s3 + $0x40] sm:$0xff] }
  0x61   : > { %v1643_v21 = vld [vmem:[%s2707_s2 + $0x30] sm:$0xff]   ;;  %v441_v22 = vld [vmem:[%s2708_s3 + $0x48] sm:$0xff]  ;;  %v443_v24 = vld [vmem:[%s2708_s3 + $0x58] sm:$0xff] }
  0x62   : > { %1458 = vmatpush3.bf16.msra.mxu0 %v1636_v6  ;;  %465 = vperm.xlu1 %1634, %v435_v12   ;;  %v442_v25 = vld [vmem:[%s2708_s3 + $0x50] sm:$0xff]  ;;  %v1644_v26 = vld [vmem:[%s2707_s2 + $0x38] sm:$0xff]   ;;  %v445_v27 = vld [vmem:[%s2708_s3 + $0x68] sm:$0xff] }
  0x63   : > { %455 = vperm.xlu0 %1633, %v433_v13   ;;  %v444_v28 = vld [vmem:[%s2708_s3 + $0x60] sm:$0xff]  ;;  %v447_v29 = vld [vmem:[%s2708_s3 + $0x78] sm:$0xff]  ;;  %v446_v30 = vld [vmem:[%s2708_s3 + $0x70] sm:$0xff] }
  0x64   : > { %v891_v43 = vld [vmem:[%s2709_s4] sm:$0xff]  ;;  %v708_v53 = vld [vmem:[%s2058_s13 + $0x30] sm:$0xff]  ;;  %v709_v2 = vld [vmem:[%s2058_s13 + $0x38] sm:$0xff] }
  0x65   : > { %1460 = vmatmul.mubr.msk.bf16.vlgmr.msra.gmra.mrb[0].mxu0 %vm580_vm0, %v1638_v8  ;;  %1507 = vmatprep.mubr.f32.mxu1 %v891_v43  ;;  %v706_v57 = vld [vmem:[%s2058_s13 + $0x20] sm:$0xff]  ;;  %v704_v62 = vld [vmem:[%s2058_s13 + $0x10] sm:$0xff]  ;;  %v707_v3 = vld [vmem:[%s2058_s13 + $0x28] sm:$0xff] }
  0x66   : > { %1463 = vmatprep.mubr.msk.bf16.mxu0 %vm580_vm0, %v1639_v9  ;;  %475 = vperm.xlu1 %1634, %v437_v16   ;;  %v702_v5 = vld [vmem:[%s2058_s13] sm:$0xff]  ;;  %v705_v6 = vld [vmem:[%s2058_s13 + $0x18] sm:$0xff]  ;;  %v703_v10 = vld [vmem:[%s2058_s13 + $0x8] sm:$0xff] }
  0x67   : > { %470 = vperm.xlu0 %1633, %v436_v17   ;;  %v712_v13 = vld [vmem:[%s2058_s13 + $0x50] sm:$0xff] }
  0x6a   : > { %485 = vperm.xlu1 %1634, %v439_v18   ;;  %v710_v18 = vld [vmem:[%s2058_s13 + $0x40] sm:$0xff] }
  0x6b   : > { %480 = vperm.xlu0 %1633, %v438_v19  }
  0x6d   : > { %1464 = vmatmul.mubr.msk.bf16.gmra.mrb[4].mxu0 %vm580_vm0, %v1640_v14 }
  0x6e   : > { %1467 = vmatprep.mubr.msk.bf16.mxu0 %vm580_vm0, %v1641_v15  ;;  %495 = vperm.xlu1 %1634, %v441_v22   ;;  %v713_v22 = vld [vmem:[%s2058_s13 + $0x58] sm:$0xff] }
  0x6f   : > { %490 = vperm.xlu0 %1633, %v440_v23  }
  0x72   : > { %505 = vperm.xlu1 %1634, %v443_v24  }
  0x73   : > { %500 = vperm.xlu0 %1633, %v442_v25  }
  0x75   : > { %1468 = vmatmul.mubr.msk.bf16.gmra.mrb[8].mxu0 %vm580_vm0, %v1642_v20 }
  0x76   : > { %1471 = vmatprep.mubr.msk.bf16.mxu0 %vm580_vm0, %v1643_v21  ;;  %515 = vperm.xlu1 %1634, %v445_v27  }
  0x77   : > { %510 = vperm.xlu0 %1633, %v444_v28  }
  0x7a   : > { %525 = vperm.xlu1 %1634, %v447_v29   ;;  %v711_v29 = vld [vmem:[%s2058_s13 + $0x48] sm:$0xff] }
  0x7b   : > { %520 = vperm.xlu0 %1633, %v446_v30  }
  0x7d   : > { %1472 = vmatmul.mubr.msk.bf16.gmra.mrb[12].mxu0 %vm580_vm0, %v1644_v26 }
  0xdd   : > { %v461_v32 = vpop.permute.xlu1 %460 }
  0xde   : > { %v451_v31 = vpop.permute.xlu0 %450 }
  0xe1   : > { %v466_v34 = vpop.permute.xlu1 %465 }
  0xe2   : > { %v456_v33 = vpop.permute.xlu0 %455 }
  0xe5   : > { %v476_v36 = vpop.permute.xlu1 %475 }
  0xe6   : > { %v471_v35 = vpop.permute.xlu0 %470 }
  0xe9   : > { %v486_v40 = vpop.permute.xlu1 %485 }
  0xea   : > { %v481_v37 = vpop.permute.xlu0 %480 }
  0xed   : > { %v496_v45 = vpop.permute.xlu1 %495 }
  0xee   : > { %v491_v44 = vpop.permute.xlu0 %490 }
  0xf1   : > { %v506_v51 = vpop.permute.xlu1 %505 }
  0xf2   : > { %v501_v50 = vpop.permute.xlu0 %500 }
  0xf5   : > { %v516_v11 = vpop.permute.xlu1 %515 }
  0xf6   : > { %v511_v61 = vpop.permute.xlu0 %510 }
  0xf9   : > { %v526_v43 = vpop.permute.xlu1 %525 }
  0xfa   : > { %v521_v30 = vpop.permute.xlu0 %520 }
 0x138   : > { %v1461_v38 = vpop.f32.mrb[0].mxu0 }
 0x139   : > { %v639_v39 = vpop.f32.mrb[1].mxu0  ;;  %v2152_v56 = vadd.f32 %v1461_v38, %v461_v32 }
 0x13a   : > { %v1462_v41 = vpop.f32.mrb[2].mxu0  ;;  %v2160_v63 = vadd.f32 %v639_v39, %v451_v31 }
 0x13b   : > { %v642_v42 = vpop.f32.mrb[3].mxu0  ;;  %2746 = vst [vmem:[#allocation19_spill] sm:$0xff] %v2152_v56  ;;  %v2162_v0 = vadd.f32 %v1462_v41, %v466_v34  ;;  %v2183_v15 = vadd.f32 %v704_v62, %v2152_v56  ;;  %v714_v41 = vld [vmem:[%s2058_s13 + $0x60] sm:$0xff] }
 0x13c   : > { %v2164_v1 = vadd.f32 %v642_v42, %v456_v33  ;;  %v2195_v20 = vadd.f32 %v702_v5, %v2160_v63 }
 0x13d   : > { %2749 = vst [vmem:[#allocation22_spill] sm:$0xff] %v2162_v0  ;;  %v2198_v21 = vadd.f32 %v705_v6, %v2162_v0 }
 0x13e   : > { %2750 = vst [vmem:[#allocation23_spill] sm:$0xff] %v2164_v1  ;;  %v2204_v24 = vadd.f32 %v703_v10, %v2164_v1 }
 0x140   : > { %v1465_v46 = vpop.f32.mrb[4].mxu0 }
 0x141   : > { %v655_v47 = vpop.f32.mrb[5].mxu0  ;;  %v2147_v52 = vadd.f32 %v1465_v46, %v481_v37 }
 0x142   : > { %v1466_v48 = vpop.f32.mrb[6].mxu0  ;;  %v2150_v54 = vadd.f32 %v655_v47, %v471_v35 }
 0x143   : > { %v658_v49 = vpop.f32.mrb[7].mxu0  ;;  %2744 = vst [vmem:[#allocation17_spill] sm:$0xff] %v2147_v52  ;;  %v2155_v58 = vadd.f32 %v1466_v48, %v486_v40  ;;  %v2171_v7 = vadd.f32 %v708_v53, %v2147_v52  ;;  %v972_v26 = vmax.f32 %v2152_v56, %v2147_v52 }
 0x144   : > { %2745 = vst [vmem:[#allocation18_spill] sm:$0xff] %v2150_v54  ;;  %v2157_v59 = vadd.f32 %v658_v49, %v476_v36  ;;  %v2177_v12 = vadd.f32 %v706_v57, %v2150_v54  ;;  %v970_v27 = vmax.f32 %v2160_v63, %v2150_v54  ;;  %v716_v36 = vld [vmem:[%s2058_s13 + $0x70] sm:$0xff]  ;;  %v717_v49 = vld [vmem:[%s2058_s13 + $0x78] sm:$0xff] }
 0x145   : > { %2747 = vst [vmem:[#allocation20_spill] sm:$0xff] %v2155_v58  ;;  %v2186_v16 = vadd.f32 %v709_v2, %v2155_v58  ;;  %v736_v25 = vmax.f32 %v2183_v15, %v2171_v7  ;;  %v973_v32 = vmax.f32 %v2162_v0, %v2155_v58 }
 0x146   : > { %2748 = vst [vmem:[#allocation21_spill] sm:$0xff] %v2157_v59  ;;  %v2189_v17 = vadd.f32 %v707_v3, %v2157_v59  ;;  %v734_v31 = vmax.f32 %v2195_v20, %v2177_v12  ;;  %v971_v33 = vmax.f32 %v2164_v1, %v2157_v59 }
 0x147   : > { %v737_v37 = vmax.f32 %v2198_v21, %v2186_v16 }
 0x148   : > { %v1469_v55 = vpop.f32.mrb[8].mxu0  ;;  %v735_v42 = vmax.f32 %v2204_v24, %v2189_v17 }
 0x149   : > { %v671_v60 = vpop.f32.mrb[9].mxu0  ;;  %v2173_v8 = vadd.f32 %v1469_v55, %v501_v50 }
 0x14a   : > { %v1470_v4 = vpop.f32.mrb[10].mxu0  ;;  %v2180_v14 = vadd.f32 %v671_v60, %v491_v44  ;;  %v715_v60 = vld [vmem:[%s2058_s13 + $0x68] sm:$0xff]  ;;  %s404_s13 = scalar_lea.vmem [#allocation7], %s2051_s0 }
 0x14b   : > { %2751 = vst [vmem:[#allocation24_spill] sm:$0xff] %v2173_v8  ;;  %v674_v9 = vpop.f32.mrb[11].mxu0  ;;  %v2192_v19 = vadd.f32 %v1470_v4, %v506_v51  ;;  %v2213_v28 = vadd.f32 %v712_v13, %v2173_v8  ;;  %v976_v44 = vmax.f32 %v972_v26, %v2173_v8  ;;  %s1177_s10 = sshll.u32 %s404_s13, 4  ;;  %s2587_s10 = int_to_ptr.vmem [resolvable:$true] %s1177_s10 }
 0x14c   : > { %2752 = vst [vmem:[#allocation25_spill] sm:$0xff] %v2180_v14  ;;  %v2201_v23 = vadd.f32 %v674_v9, %v496_v45  ;;  %v2223_v34 = vadd.f32 %v710_v18, %v2180_v14  ;;  %v974_v45 = vmax.f32 %v970_v27, %v2180_v14  ;;  %s1709_s9 = scalar_lea.vmem %s2587_s10, 16 }
 0x14d   : > { %2753 = vst [vmem:[#allocation26_spill] sm:$0xff] %v2192_v19  ;;  %v2229_v38 = vadd.f32 %v713_v22, %v2192_v19  ;;  %v740_v50 = vmax.f32 %v736_v25, %v2213_v28  ;;  %v977_v51 = vmax.f32 %v973_v32, %v2192_v19  ;;  %p1710_p3 = scmp.ne.s32.totalorder %s2587_s10, %s1709_s9 }
 0x14e   : > { %2754 = vst [vmem:[#allocation27_spill] sm:$0xff] %v2201_v23  ;;  %v2239_v46 = vadd.f32 %v711_v29, %v2201_v23  ;;  %v738_v62 = vmax.f32 %v734_v31, %v2223_v34  ;;  %v975_v2 = vmax.f32 %v971_v33, %v2201_v23 }
 0x14f   : > { %v741_v4 = vmax.f32 %v737_v37, %v2229_v38  ;;  %v755_v37 = vlaneseq  ;;  %p1711_p9 = pnand %p1710_p3, %p2770_p8 }
 0x150   : > { %v1473_v35 = vpop.f32.mrb[12].mxu0  ;;  %v739_v22 = vmax.f32 %v735_v42, %v2239_v46 }
 0x151   : > { %v2231_v39 = vadd.f32 %v1473_v35, %v521_v30  ;;  %v687_v40 = vpop.f32.mrb[13].mxu0  ;;  %p1712_p12 = pneg %p1711_p9 }
 0x152   : > { %v2241_v47 = vadd.f32 %v687_v40, %v511_v61  ;;  %v1474_v48 = vpop.f32.mrb[14].mxu0 }
 0x153   : > { %v2247_v53 = vadd.f32 %v716_v36, %v2231_v39  ;;  %v2249_v55 = vadd.f32 %v1474_v48, %v526_v43  ;;  %v690_v57 = vpop.f32.mrb[15].mxu0  ;;  %v980_v5 = vmax.f32 %v976_v44, %v2231_v39  ;;  %v2275_v44 = vshrl.u32 %v755_v37, 7 }
 0x154   : > { %2755 = vst [vmem:[#allocation28_spill] sm:$0xff] %v2241_v47  ;;  %v2255_v61 = vadd.f32 %v714_v41, %v2241_v47  ;;  %v2257_v3 = vadd.f32 %v690_v57, %v516_v11  ;;  %v978_v10 = vmax.f32 %v974_v45, %v2241_v47 }
 0x155   : > { %v2262_v6 = vadd.f32 %v717_v49, %v2249_v55  ;;  %v981_v9 = vmax.f32 %v977_v51, %v2249_v55  ;;  %v744_v11 = vmax.f32 %v740_v50, %v2247_v53  ;;  %v2278_v50 = vadd.s32 8, %v2275_v44 }
 0x156   : > { %2756 = vst [vmem:[#allocation29_spill] sm:$0xff] %v2257_v3  ;;  %v2267_v13 = vadd.f32 %v715_v60, %v2257_v3  ;;  %v979_v18 = vmax.f32 %v975_v2, %v2257_v3  ;;  %v742_v27 = vmax.f32 %v738_v62, %v2255_v61  ;;  %v2281_v51 = vadd.s32 16, %v2275_v44 }
 0x157   : > { %v745_v25 = vmax.f32 %v741_v4, %v2262_v6  ;;  %v983_v26 = vmax.f32 %v980_v5, %v981_v9  ;;  %v2286_v62 = vadd.s32 24, %v2275_v44  ;;  %v2289_v2 = vadd.s32 32, %v2275_v44 }
 0x158   : > { %v982_v29 = vmax.f32 %v978_v10, %v979_v18  ;;  %v743_v30 = vmax.f32 %v739_v22, %v2267_v13  ;;  %v2292_v4 = vadd.s32 40, %v2275_v44  ;;  %v2295_v5 = vadd.s32 48, %v2275_v44 }
 0x159   : > { %v747_v31 = vmax.f32 %v744_v11, %v745_v25  ;;  %v2298_v9 = vadd.s32 56, %v2275_v44  ;;  %v2301_v10 = vadd.s32 64, %v2275_v44  ;;  %v2308_v11 = vadd.s32 72, %v2275_v44 }
 0x15a   : > { %v984_v32 = vmax.f32 %v982_v29, %v983_v26  ;;  %v746_v33 = vmax.f32 %v742_v27, %v743_v30  ;;  %v2311_v25 = vadd.s32 80, %v2275_v44  ;;  %v2316_v27 = vadd.s32 88, %v2275_v44 }
 0x15b   : > { %v2319_v29 = vadd.s32 96, %v2275_v44  ;;  %v2322_v30 = vadd.s32 104, %v2275_v44 }
 0x15c   : > { %v985_v35 = vrot.slane %v984_v32, 4  ;;  %v748_v36 = vmax.f32 %v746_v33, %v747_v31  ;;  %v2327_v33 = vadd.s32 112, %v2275_v44 }
 0x15e   : > { %v986_v40 = vmax.f32 %v984_v32, %v985_v35  ;;  %v749_v41 = vrot.slane %v748_v36, 4  ;;  %v2330_v35 = vadd.s32 120, %v2275_v44 }
 0x160   : > { %v987_v43 = vrot.slane %v986_v40, 2  ;;  %v750_v42 = vmax.f32 %v748_v36, %v749_v41 }
 0x162   : > { %v988_v45 = vmax.f32 %v986_v40, %v987_v43  ;;  %v751_v48 = vrot.slane %v750_v42, 2 }
 0x164   : > { %v989_v49 = vrot.slane %v988_v45, 1  ;;  %v752_v60 = vmax.f32 %v750_v42, %v751_v48 }
 0x166   : > { %v2283_v57 = vmax.f32 %v988_v45, %v989_v49  ;;  %v753_v32 = vrot.slane %v752_v60, 1 }
 0x168   : > { %v991_v18 = vsub.f32 %v2160_v63, %v2283_v57  ;;  %v992_v22 = vsub.f32 %v2164_v1, %v2283_v57  ;;  %v993_v26 = vsub.f32 %v2152_v56, %v2283_v57  ;;  %v994_v31 = vsub.f32 %v2162_v0, %v2283_v57 }
 0x169   : > { %v995_v36 = vsub.f32 %v2150_v54, %v2283_v57  ;;  %v996_v37 = vsub.f32 %v2157_v59, %v2283_v57  ;;  %v997_v40 = vsub.f32 %v2147_v52, %v2283_v57  ;;  %v998_v41 = vsub.f32 %v2155_v58, %v2283_v57 }
 0x16a   : > { %v999_v43 = vsub.f32 %v2180_v14, %v2283_v57  ;;  %v1000_v42 = vsub.f32 %v2201_v23, %v2283_v57  ;;  %v1007_v45 = vmul.f32 1.442695, %v991_v18  ;;  %v1009_v48 = vmul.f32 1.442695, %v992_v22 }
 0x16b   : > { %v1001_v49 = vsub.f32 %v2173_v8, %v2283_v57  ;;  %v1002_v59 = vsub.f32 %v2192_v19, %v2283_v57  ;;  %v1003_v52 = vsub.f32 %v2241_v47, %v2283_v57  ;;  %v1011_v54 = vmul.f32 1.442695, %v993_v26 }
 0x16c   : > { %v1004_v58 = vsub.f32 %v2257_v3, %v2283_v57  ;;  %1645 = vpow2.f32 %v1007_v45  ;;  %v1013_v14 = vmul.f32 1.442695, %v994_v31  ;;  %v2352_v0 = vmax.f32 %v752_v60, %v753_v32 }
 0x16d   : > { %v1005_v18 = vsub.f32 %v2231_v39, %v2283_v57  ;;  %1647 = vpow2.f32 %v1009_v48  ;;  %v1015_v22 = vmul.f32 1.442695, %v995_v36  ;;  %v1017_v8 = vmul.f32 1.442695, %v996_v37 }
 0x16e   : > { %v1006_v19 = vsub.f32 %v2249_v55, %v2283_v57  ;;  %v1019_v23 = vmul.f32 1.442695, %v997_v40  ;;  %v1021_v56 = vmul.f32 1.442695, %v998_v41  ;;  %v1023_v47 = vmul.f32 1.442695, %v999_v43 }
 0x16f   : > { %1649 = vpow2.f32 %v1011_v54  ;;  %v1025_v26 = vmul.f32 1.442695, %v1000_v42  ;;  %v1027_v1 = vmul.f32 1.442695, %v1001_v49  ;;  %v2358_v3 = vmul.f32 1.442695, %v1002_v59 }
 0x170   : > { %1651 = vpow2.f32 %v1013_v14  ;;  %v2360_v60 = vmul.f32 1.442695, %v1003_v52  ;;  %v2362_v31 = vmul.f32 1.442695, %v1004_v58  ;;  %vm772_vm1 = vcmp.eq.f32.partialorder %v2195_v20, %v2352_v0 }
 0x171   : > { %1653 = vpow2.f32 %v1015_v22  ;;  %vm773_vm2 = vcmp.eq.f32.partialorder %v2204_v24, %v2352_v0  ;;  %vm774_vm3 = vcmp.eq.f32.partialorder %v2183_v15, %v2352_v0  ;;  %vm775_vm4 = vcmp.eq.f32.partialorder %v2198_v21, %v2352_v0 }
 0x172   : > { %1655 = vpow2.f32 %v1017_v8  ;;  %vm776_vm5 = vcmp.eq.f32.partialorder %v2177_v12, %v2352_v0  ;;  %vm777_vm6 = vcmp.eq.f32.partialorder %v2189_v17, %v2352_v0  ;;  %vm778_vm7 = vcmp.eq.f32.partialorder %v2171_v7, %v2352_v0 }
 0x173   : > { %1657 = vpow2.f32 %v1019_v23  ;;  %vm779_vm8 = vcmp.eq.f32.partialorder %v2186_v16, %v2352_v0  ;;  %vm780_vm9 = vcmp.eq.f32.partialorder %v2223_v34, %v2352_v0  ;;  %vm781_vm10 = vcmp.eq.f32.partialorder %v2239_v46, %v2352_v0 }
 0x174   : > { %1659 = vpow2.f32 %v1021_v56  ;;  %vm782_vm11 = vcmp.eq.f32.partialorder %v2213_v28, %v2352_v0  ;;  %vm783_vm12 = vcmp.eq.f32.partialorder %v2229_v38, %v2352_v0  ;;  %vm784_vm13 = vcmp.eq.f32.partialorder %v2255_v61, %v2352_v0 }
 0x175   : > { %1661 = vpow2.f32 %v1023_v47  ;;  %vm785_vm14 = vcmp.eq.f32.partialorder %v2267_v13, %v2352_v0  ;;  %vm786_vm15 = vcmp.eq.f32.partialorder %v2247_v53, %v2352_v0  ;;  %vm787_vm0 = vcmp.eq.f32.partialorder %v2262_v6, %v2352_v0 }
 0x176   : > { %v2396_v52 = vpop.eup %1645  ;;  %1663 = vpow2.f32 %v1025_v26  ;;  %v788_v54 = vsel %vm772_vm1, %v2275_v44, 128  ;;  %v789_v56 = vsel %vm773_vm2, %v2278_v50, 128  ;;  %v790_v58 = vsel %vm774_vm3, %v2281_v51, 128 }
 0x177   : > { %v2410_v59 = vpop.eup %1647  ;;  %1665 = vpow2.f32 %v1027_v1  ;;  %v791_v8 = vsel %vm775_vm4, %v2286_v62, 128  ;;  %v792_v14 = vsel %vm776_vm5, %v2289_v2, 128  ;;  %v793_v20 = vsel %vm777_vm6, %v2292_v4, 128 }
 0x178   : > { %v1039_v15 = vadd.f32 %v2410_v59, %v2396_v52  ;;  %v794_v1 = vsel %vm778_vm7, %v2295_v5, 128  ;;  %v795_v21 = vsel %vm779_vm8, %v2298_v9, 128  ;;  %v796_v12 = vsel %vm780_vm9, %v2301_v10, 128 }
 0x179   : > { %v2438_v17 = vpop.eup %1649  ;;  %v797_v23 = vsel %vm781_vm10, %v2308_v11, 128  ;;  %v798_v7 = vsel %vm782_vm11, %v2311_v25, 128  ;;  %v799_v16 = vsel %vm783_vm12, %v2316_v27, 128  ;;  %v800_v24 = vsel %vm784_vm13, %v2319_v29, 128 }
 0x17a   : > { %v2456_v34 = vpop.eup %1651  ;;  %v1040_v46 = vadd.f32 %v2438_v17, %v1039_v15  ;;  %v801_v28 = vsel %vm785_vm14, %v2322_v30, 128  ;;  %v802_v38 = vsel %vm786_vm15, %v2327_v33, 128  ;;  %vm804_vm1 = vcmp.lt.s32.totalorder %v788_v54, %v792_v14 }
 0x17b   : > { %v2467_v47 = vpop.eup %1653  ;;  %v803_v61 = vsel %vm787_vm0, %v2330_v35, 128  ;;  %v805_v32 = vsel %vm804_vm1, %v788_v54, %v792_v14  ;;  %vm806_vm2 = vcmp.lt.s32.totalorder %v789_v56, %v793_v20  ;;  %vm808_vm3 = vcmp.lt.s32.totalorder %v790_v58, %v794_v1 }
 0x17c   : > { %v2473_v36 = vpop.eup %1655  ;;  %v1041_v13 = vadd.f32 %v2456_v34, %v1040_v46  ;;  %v807_v37 = vsel %vm806_vm2, %v789_v56, %v793_v20  ;;  %v809_v40 = vsel %vm808_vm3, %v790_v58, %v794_v1  ;;  %vm810_vm4 = vcmp.lt.s32.totalorder %v791_v8, %v795_v21 }
 0x17d   : > { %v2476_v53 = vpop.eup %1657  ;;  %v811_v41 = vsel %vm810_vm4, %v791_v8, %v795_v21  ;;  %vm812_vm5 = vcmp.lt.s32.totalorder %v805_v32, %v796_v12  ;;  %vm814_vm6 = vcmp.lt.s32.totalorder %v807_v37, %v797_v23  ;;  %vm816_vm7 = vcmp.lt.s32.totalorder %v809_v40, %v798_v7 }
 0x17e   : > { %v2478_v43 = vpop.eup %1659  ;;  %v1042_v0 = vadd.f32 %v2467_v47, %v1041_v13  ;;  %v813_v6 = vsel %vm812_vm5, %v805_v32, %v796_v12  ;;  %v815_v42 = vsel %vm814_vm6, %v807_v37, %v797_v23  ;;  %v817_v45 = vsel %vm816_vm7, %v809_v40, %v798_v7 }
 0x17f   : > { %v2481_v48 = vpop.eup %1661  ;;  %vm818_vm8 = vcmp.lt.s32.totalorder %v811_v41, %v799_v16  ;;  %vm820_vm9 = vcmp.lt.s32.totalorder %v813_v6, %v800_v24  ;;  %vm822_vm10 = vcmp.lt.s32.totalorder %v815_v42, %v801_v28  ;;  %vm824_vm11 = vcmp.lt.s32.totalorder %v817_v45, %v802_v38 }
 0x180   : > { %v2483_v49 = vpop.eup %1663  ;;  %v1043_v22 = vadd.f32 %v2473_v36, %v1042_v0  ;;  %v819_v26 = vsel %vm818_vm8, %v811_v41, %v799_v16  ;;  %v821_v54 = vsel %vm820_vm9, %v813_v6, %v800_v24  ;;  %v823_v56 = vsel %vm822_vm10, %v815_v42, %v801_v28 }
 0x181   : > { %v2486_v58 = vpop.eup %1665  ;;  %1667 = vpow2.f32 %v2358_v3  ;;  %v825_v8 = vsel %vm824_vm11, %v817_v45, %v802_v38  ;;  %vm826_vm12 = vcmp.lt.s32.totalorder %v819_v26, %v803_v61  ;;  %vm828_vm13 = vcmp.lt.s32.totalorder %v821_v54, %v823_v56 }
 0x182   : > { %v1044_v14 = vadd.f32 %v2476_v53, %v1043_v22  ;;  %v827_v20 = vsel %vm826_vm12, %v819_v26, %v803_v61  ;;  %v829_v15 = vsel %vm828_vm13, %v821_v54, %v823_v56  ;;  %1669 = vpow2.f32 %v2360_v60  ;;  %v2759_v26 = vld [vmem:[#allocation22_spill] sm:$0xff] }
 0x183   : > { %v1035_v1 = vmul.f32 1.442695, %v1005_v18  ;;  %vm830_vm14 = vcmp.lt.s32.totalorder %v825_v8, %v827_v20  ;;  %1671 = vpow2.f32 %v2362_v31  ;;  %v1037_v3 = vmul.f32 1.442695, %v1006_v19  ;;  %v2760_v56 = vld [vmem:[#allocation18_spill] sm:$0xff] }
 0x184   : > { %v1045_v21 = vadd.f32 %v2478_v43, %v1044_v14  ;;  %v831_v12 = vsel %vm830_vm14, %v825_v8, %v827_v20  ;;  %v1874_v45 = vmov 1.0|1.0   ;;  %v2761_v20 = vld [vmem:[#allocation21_spill] sm:$0xff] }
 0x185   : > { %vm832_vm15 = vcmp.lt.s32.totalorder %v829_v15, %v831_v12  ;;  %1673 = vpow2.f32 %v1035_v1 }
 0x186   : > { %v1046_v23 = vadd.f32 %v2481_v48, %v1045_v21  ;;  %v833_v7 = vsel %vm832_vm15, %v829_v15, %v831_v12  ;;  %1675 = vpow2.f32 %v1037_v3  ;;  %v2762_v21 = vld [vmem:[#allocation17_spill] sm:$0xff] }
 0x187   : > { %v834_v60 = vrot.slane %v833_v7, 4 }
 0x188   : > { %v1047_v16 = vadd.f32 %v2483_v49, %v1046_v23 }
 0x189   : > { %vm835_vm0 = vcmp.lt.s32.totalorder %v833_v7, %v834_v60 }
 0x18a   : > { %v1048_v18 = vadd.f32 %v2486_v58, %v1047_v16  ;;  %v836_v24 = vsel %vm835_vm0, %v833_v7, %v834_v60  ;;  %v2763_v60 = vld [vmem:[#allocation20_spill] sm:$0xff] }
 0x18b   : > { %v2502_v46 = vpop.eup %1667  ;;  %v837_v31 = vrot.slane %v836_v24, 2 }
 0x18c   : > { %v1049_v28 = vadd.f32 %v2502_v46, %v1048_v18  ;;  %v2505_v38 = vpop.eup %1669 }
 0x18d   : > { %vm838_vm1 = vcmp.lt.s32.totalorder %v836_v24, %v837_v31  ;;  %v2508_v32 = vpop.eup %1671 }
 0x18e   : > { %v1050_v19 = vadd.f32 %v2505_v38, %v1049_v28  ;;  %v839_v61 = vsel %vm838_vm1, %v836_v24, %v837_v31  ;;  %v2764_v28 = vld [vmem:[#allocation25_spill] sm:$0xff] }
 0x18f   : > { %v840_v13 = vrot.slane %v839_v61, 1  ;;  %v2511_v40 = vpop.eup %1673 }
 0x190   : > { %v1051_v37 = vadd.f32 %v2508_v32, %v1050_v19  ;;  %v2514_v6 = vpop.eup %1675 }
 0x191   : > { %vm841_vm2 = vcmp.lt.s32.totalorder %v839_v61, %v840_v13 }
 0x192   : > { %v1052_v41 = vadd.f32 %v2511_v40, %v1051_v37  ;;  %v842_v0 = vsel %vm841_vm2, %v839_v61, %v840_v13  ;;  %v2765_v13 = vld [vmem:[#allocation27_spill] sm:$0xff] }
 0x193   : > { %vm843_vm3 = vcmp.eq.s32.totalorder %v2275_v44, %v842_v0  ;;  %vm844_vm4 = vcmp.eq.s32.totalorder %v2278_v50, %v842_v0  ;;  %vm845_vm5 = vcmp.eq.s32.totalorder %v2281_v51, %v842_v0  ;;  %vm846_vm6 = vcmp.eq.s32.totalorder %v2286_v62, %v842_v0  ;;  %1134 = vst [vmem:[%s404_s13] sm:$0x1] %v842_v0  ;;  %s1713_s13 = sshll.u32 %s1875_s17, 4  ;;  %s1714_s13 = int_to_ptr.vmem [resolvable:$false] %s1713_s13 }
 0x194   : > { %v1053_v42 = vadd.f32 %v2514_v6, %v1052_v41  ;;  %vm1510_vm7 = vmpackc.low %vm844_vm4, %vm843_vm3  ;;  %vm847_vm9 = vcmp.eq.s32.totalorder %v2289_v2, %v842_v0  ;;  %vm848_vm10 = vcmp.eq.s32.totalorder %v2292_v4, %v842_v0  ;;  %vm849_vm12 = vcmp.eq.s32.totalorder %v2295_v5, %v842_v0  ;;  %s1715_s18 = scalar_lea.vmem %s1714_s13, 32  ;;  %p1716_p10 = scmp.lt.s32.totalorder %s2587_s10, %s1714_s13 }
 0x195   : > { %1511 = vmatprep.subr.msk.bf16.mxu1 %vm1510_vm7, %v1874_v45  ;;  %vm1514_vm8 = vmpackc.low %vm846_vm6, %vm845_vm5  ;;  %vm850_vm13 = vcmp.eq.s32.totalorder %v2298_v9, %v842_v0  ;;  %vm851_vm15 = vcmp.eq.s32.totalorder %v2301_v10, %v842_v0  ;;  %vm852_vm0 = vcmp.eq.s32.totalorder %v2308_v11, %v842_v0  ;;  %vm853_vm2 = vcmp.eq.s32.totalorder %v2311_v25, %v842_v0  ;;  %v2757_v11 = vld [vmem:[#allocation23_spill] sm:$0xff]  ;;  %p1717_p11 = scmp.lt.s32.totalorder %s1715_s18, %s1709_s9 }
 0x196   : > { %v1054_v22 = vrot.slane %v1053_v42, 4  ;;  %1513 = vmatpush3.bf16.msk.msra.mxu1 %vm1510_vm7, %v1874_v45  ;;  %vm1518_vm11 = vmpackc.low %vm848_vm10, %vm847_vm9  ;;  %vm854_vm3 = vcmp.eq.s32.totalorder %v2316_v27, %v842_v0  ;;  %vm855_vm5 = vcmp.eq.s32.totalorder %v2319_v29, %v842_v0  ;;  %vm856_vm6 = vcmp.eq.s32.totalorder %v2322_v30, %v842_v0  ;;  %v892_v27 = vld [vmem:[%s2709_s4 + $0x8] sm:$0xff]  ;;  %v2758_v29 = vld [vmem:[#allocation19_spill] sm:$0xff] }
 0x197   : > { %1515 = vmatprep.subr.msk.bf16.mxu1 %vm1514_vm8, %v1874_v45  ;;  %vm1522_vm14 = vmpackc.low %vm850_vm13, %vm849_vm12  ;;  %vm858_vm9 = vcmp.eq.s32.totalorder %v2330_v35, %v842_v0  ;;  %p1718_p13 = por %p1717_p11, %p1716_p10 }
 0x198   : > { %v1055_v44 = vadd.f32 %v1054_v22, %v1053_v42  ;;  %vm1526_vm1 = vmpackc.low %vm852_vm0, %vm851_vm15 }
 0x199   : > { %vm1530_vm4 = vmpackc.low %vm854_vm3, %vm853_vm2  ;;  %p1719_p0 = pnand %p1718_p13, %p1712_p12 }
 0x19a   : > { %v1056_v50 = vrot.slane %v1055_v44, 2  ;;  %1517 = vmatpush3.bf16.msk.msra.mxu1 %vm1514_vm8, %v1874_v45  ;;  %vm1534_vm7 = vmpackc.low %vm856_vm6, %vm855_vm5  ;;  %vm857_vm8 = vcmp.eq.s32.totalorder %v2327_v33, %v842_v0 }
 0x19b   : > { %1519 = vmatprep.subr.msk.bf16.mxu1 %vm1518_vm11, %v1874_v45  ;;  %vm1538_vm10 = vmpackc.low %vm858_vm9, %vm857_vm8 }
 0x19c   : > { %v1057_v51 = vadd.f32 %v1056_v50, %v1055_v44 }
 0x19e   : > { %v1058_v62 = vrot.slane %v1057_v51, 1  ;;  %1521 = vmatpush3.bf16.msk.msra.mxu1 %vm1518_vm11, %v1874_v45 }
 0x19f   : > { %1523 = vmatprep.subr.msk.bf16.mxu1 %vm1522_vm14, %v1874_v45 }
 0x1a0   : > { %v2530_v2 = vadd.f32 %v1058_v62, %v1057_v51 }
 0x1a2   : > { %1677 = vlog2.f32 %v2530_v2  ;;  %1525 = vmatpush3.bf16.msk.msra.mxu1 %vm1522_vm14, %v1874_v45 }
 0x1a3   : > { %1527 = vmatprep.subr.msk.bf16.mxu1 %vm1526_vm1, %v1874_v45  ;;  %1679 = vrcp.f32 %v2530_v2 }
 0x1a6   : > { %1529 = vmatpush3.bf16.msk.msra.mxu1 %vm1526_vm1, %v1874_v45 }
 0x1a7   : > { %1531 = vmatprep.subr.msk.bf16.mxu1 %vm1530_vm4, %v1874_v45 }
 0x1aa   : > { %1533 = vmatpush3.bf16.msk.msra.mxu1 %vm1530_vm4, %v1874_v45 }
 0x1ab   : > { %1535 = vmatprep.subr.msk.bf16.mxu1 %vm1534_vm7, %v1874_v45 }
 0x1ac   : > { %v1678_v4 = vpop.eup %1677 }
 0x1ad   : > { %v1061_v5 = vmul.f32 0.6931472, %v1678_v4 }
 0x1ae   : > { %1537 = vmatpush3.bf16.msk.msra.mxu1 %vm1534_vm7, %v1874_v45 }
 0x1af   : > { %v1062_v9 = vadd.f32 %v1061_v5, %v2283_v57  ;;  %1539 = vmatprep.subr.msk.bf16.mxu1 %vm1538_vm10, %v1874_v45 }
 0x1b1   : > { %v1063_v10 = vsub.f32 %v2160_v63, %v1062_v9  ;;  %v1064_v25 = vsub.f32 %v2757_v11, %v1062_v9  ;;  %v1065_v30 = vsub.f32 %v2758_v29, %v1062_v9  ;;  %v1066_v54 = vsub.f32 %v2759_v26, %v1062_v9 }
 0x1b2   : > { %1541 = vmatpush3.bf16.msk.msra.mxu1 %vm1538_vm10, %v1874_v45  ;;  %v1067_v8 = vsub.f32 %v2760_v56, %v1062_v9  ;;  %v1068_v15 = vsub.f32 %v2761_v20, %v1062_v9  ;;  %v1069_v12 = vsub.f32 %v2762_v21, %v1062_v9  ;;  %v1070_v16 = vsub.f32 %v2763_v60, %v1062_v9 }
 0x1b3   : > { %v1079_v33 = vadd.f32 4.8520303, %v1063_v10  ;;  %v1080_v35 = vadd.f32 4.8520303, %v1064_v25  ;;  %v1081_v57 = vadd.f32 4.8520303, %v1065_v30  ;;  %v1071_v19 = vsub.f32 %v2764_v28, %v1062_v9 }
 0x1b4   : > { %v1082_v1 = vadd.f32 4.8520303, %v1066_v54  ;;  %v1083_v3 = vadd.f32 4.8520303, %v1067_v8  ;;  %v1084_v18 = vadd.f32 4.8520303, %v1068_v15  ;;  %v1072_v37 = vsub.f32 %v2765_v13, %v1062_v9 }
 0x1b5   : > { %1508 = vmatmul.mubr.f32.vlgmr.msra.gmra.mrb[0].mxu1 %v892_v27  ;;  %v1095_v14 = vmul.f32 %v2396_v52, %v1079_v33  ;;  %v1096_v63 = vmul.f32 %v2410_v59, %v1080_v35  ;;  %v1097_v23 = vmul.f32 %v2438_v17, %v1081_v57  ;;  %v1085_v52 = vadd.f32 4.8520303, %v1069_v12  ;;  %v2766_v17 = vld [vmem:[#allocation24_spill] sm:$0xff] }
 0x1b6   : > { %v1098_v24 = vmul.f32 %v2456_v34, %v1082_v1  ;;  %v1099_v59 = vmul.f32 %v2467_v47, %v1083_v3  ;;  %v1086_v41 = vadd.f32 4.8520303, %v1070_v16  ;;  %v1100_v0 = vmul.f32 %v2473_v36, %v1084_v18  ;;  %v2767_v34 = vld [vmem:[#allocation26_spill] sm:$0xff]  ;;  %v2768_v47 = vld [vmem:[#allocation28_spill] sm:$0xff]  ;;  %v2769_v36 = vld [vmem:[#allocation29_spill] sm:$0xff] }
 0x1b7   : > { %v1111_v7 = vadd.f32 %v1096_v63, %v1095_v14  ;;  %v1073_v45 = vsub.f32 %v2766_v17, %v1062_v9  ;;  %v1087_v22 = vadd.f32 4.8520303, %v1071_v19  ;;  %v1101_v44 = vmul.f32 %v2476_v53, %v1085_v52 }
 0x1b8   : > { %v1074_v51 = vsub.f32 %v2767_v34, %v1062_v9  ;;  %v1088_v62 = vadd.f32 4.8520303, %v1072_v37  ;;  %v1102_v4 = vmul.f32 %v2478_v43, %v1086_v41  ;;  %v1075_v10 = vsub.f32 %v2768_v47, %v1062_v9 }
 0x1b9   : > { %v1112_v31 = vadd.f32 %v1111_v7, %v1097_v23  ;;  %v1089_v11 = vadd.f32 4.8520303, %v1073_v45  ;;  %v1103_v25 = vmul.f32 %v2481_v48, %v1087_v22  ;;  %v1076_v29 = vsub.f32 %v2769_v36, %v1062_v9  ;;  %v1680_v7 = vpop.eup %1679 }
 0x1ba   : > { %v1090_v30 = vadd.f32 4.8520303, %v1074_v51  ;;  %v1104_v33 = vmul.f32 %v2483_v49, %v1088_v62  ;;  %v1077_v53 = vsub.f32 %v2231_v39, %v1062_v9  ;;  %v1091_v26 = vadd.f32 4.8520303, %v1075_v10 }
 0x1bb   : > { %v1113_v61 = vadd.f32 %v1112_v31, %v1098_v24  ;;  %v1105_v54 = vmul.f32 %v2486_v58, %v1089_v11  ;;  %v1078_v43 = vsub.f32 %v2249_v55, %v1062_v9  ;;  %v1092_v8 = vadd.f32 4.8520303, %v1076_v29 }
 0x1bc   : > { %v1106_v57 = vmul.f32 %v2502_v46, %v1090_v30  ;;  %v1093_v48 = vadd.f32 4.8520303, %v1077_v53  ;;  %v1107_v63 = vmul.f32 %v2505_v38, %v1091_v26 }
 0x1bd   : > { %v1114_v42 = vadd.f32 %v1113_v61, %v1099_v59  ;;  %v1094_v15 = vadd.f32 4.8520303, %v1078_v43  ;;  %v1108_v49 = vmul.f32 %v2508_v32, %v1092_v8 }
 0x1be   : > { %v1109_v39 = vmul.f32 %v2511_v40, %v1093_v48 }
 0x1bf   : > { %v1115_v50 = vadd.f32 %v1114_v42, %v1100_v0  ;;  %v1110_v55 = vmul.f32 %v2514_v6, %v1094_v15 }
 0x1c1   : > { %v1116_v5 = vadd.f32 %v1115_v50, %v1101_v44 }
 0x1c3   : > { %v1117_v27 = vadd.f32 %v1116_v5, %v1102_v4 }
 0x1c5   : > { %v1118_v35 = vadd.f32 %v1117_v27, %v1103_v25 }
 0x1c7   : > { %v1119_v56 = vadd.f32 %v1118_v35, %v1104_v33 }
 0x1c9   : > { %v1120_v14 = vadd.f32 %v1119_v56, %v1105_v54 }
 0x1cb   : > { %v1121_v20 = vadd.f32 %v1120_v14, %v1106_v57 }
 0x1cd   : > { %v1122_v1 = vadd.f32 %v1121_v20, %v1107_v63 }
 0x1cf   : > { %v1123_v58 = vadd.f32 %v1122_v1, %v1108_v49 }
 0x1d1   : > { %v1124_v46 = vadd.f32 %v1123_v58, %v1109_v39 }
 0x1d3   : > { %v1125_v9 = vadd.f32 %v1124_v46, %v1110_v55 }
 0x1d5   : > { %v1126_v21 = vrot.slane %v1125_v9, 4 }
 0x1d7   : > { %v1127_v38 = vadd.f32 %v1126_v21, %v1125_v9 }
 0x1d9   : > { %v1128_v12 = vrot.slane %v1127_v38, 2 }
 0x1db   : > { %v1129_v32 = vadd.f32 %v1128_v12, %v1127_v38 }
 0x1dd   : > { %v1130_v3 = vrot.slane %v1129_v32, 1 }
 0x1df   : > { %v1131_v23 = vadd.f32 %v1130_v3, %v1129_v32 }
 0x1e1   : > { %v1133_v40 = vmul.f32 %v1680_v7, %v1131_v23 }
 0x1e3   : > { %1135 = vst [vmem:[%s2732_s22] sm:$0x1] %v1133_v40 }
 0x1e4   : > { %1722 = shalt.err (!%p1719_p0)
}
 0x1e5   : > { %s1723_s21 = scalar_lea.hbm %s1175_s19, 16  ;;  %s1727_s20 = scalar_lea.hbm %s2711_s6, 64 }
 0x1e6   : > { %p1724_p1 = scmp.ne.s32.totalorder %s1175_s19, %s1723_s21  ;;  %p1728_p2 = scmp.lt.u32.totalorder %s1175_s19, %s2711_s6 }
 0x1e7   : > { %p1729_p6 = scmp.lt.u32.totalorder %s1727_s20, %s1723_s21  ;;  %p1731_p3 = scmp.lt.u32.totalorder %s1723_s21, %s1175_s19 }
 0x1e8   : > { %p1725_p4 = pnand %p1724_p1, %p2770_p8 }
 0x1e9   : > { %p1730_p7 = por %p1729_p6, %p1728_p2 }
 0x1ea   : > { %p1726_p5 = pneg %p1725_p4 }
 0x1eb   : > { %p1732_p9 = por %p1731_p3, %p1730_p7 }
 0x1ed   : > { %p1733_p12 = pnand %p1732_p9, %p1726_p5 }
 0x1ef   : > { %1736 = shalt.err (!%p1733_p12)
}
 0x1f0   : > { %1545 = dma.vmem_to_hbm [thread:$0]  (%p2770_p8), %s2587_s10, 16, %s1175_s19, %s2594_s23  }
 0x1f1   : > { %s2771_s9 = sshll.u32 %s2582_s11, 4  ;;  %s2772_s20 = scalar_lea.vmem [#allocation9], %s2051_s0 }
 0x1f2   : > { %s2618_s22 = scalar_lea.hbm %s2712_s7, %s2771_s9  ;;  %s1192_s12 = sshll.u32 %s2772_s20, 4  ;;  %s1193_s12 = int_to_ptr.vmem [resolvable:$true] %s1192_s12 }
 0x1f3   : > { %s1737_s18 = scalar_lea.vmem %s1193_s12, 16  ;;  %s1876_s21 = smov [#allocation9]  }
 0x1f4   : > { %p1738_p10 = scmp.ne.s32.totalorder %s1193_s12, %s1737_s18  ;;  %s1741_s14 = sshll.u32 %s1876_s21, 4  ;;  %s1742_s14 = int_to_ptr.vmem [resolvable:$false] %s1741_s14 }
 0x1f5   : > { %s1743_s15 = scalar_lea.vmem %s1742_s14, 32  ;;  %p1744_p0 = scmp.lt.s32.totalorder %s1193_s12, %s1742_s14 }
 0x1f6   : > { %p1739_p11 = pnand %p1738_p10, %p2770_p8  ;;  %p1745_p1 = scmp.lt.s32.totalorder %s1743_s15, %s1737_s18 }
 0x1f8   : > { %p1740_p13 = pneg %p1739_p11  ;;  %p1746_p4 = por %p1745_p1, %p1744_p0 }
 0x1fa   : > { %p1747_p5 = pnand %p1746_p4, %p1740_p13 }
 0x1fc   : > { %1750 = shalt.err (!%p1747_p5)
}
 0x1fd   : > { %s1751_s11 = scalar_lea.hbm %s2618_s22, 16  ;;  %s1755_s9 = scalar_lea.hbm %s2712_s7, 64 }
 0x1fe   : > { %p1752_p2 = scmp.ne.s32.totalorder %s2618_s22, %s1751_s11  ;;  %p1756_p3 = scmp.lt.u32.totalorder %s2618_s22, %s2712_s7 }
 0x1ff   : > { %p1757_p9 = scmp.lt.u32.totalorder %s1755_s9, %s1751_s11  ;;  %p1759_p10 = scmp.lt.u32.totalorder %s1751_s11, %s2618_s22 }
 0x200   : > { %p1753_p6 = pnand %p1752_p2, %p2770_p8 }
 0x201   : > { %p1758_p12 = por %p1757_p9, %p1756_p3 }
 0x202   : > { %p1754_p7 = pneg %p1753_p6 }
 0x203   : > { %p1760_p11 = por %p1759_p10, %p1758_p12 }
 0x205   : > { %p1761_p13 = pnand %p1760_p11, %p1754_p7 }
 0x207   : > { %1764 = shalt.err (!%p1761_p13)
}
 0x208   : > { %1546 = dma.vmem_to_hbm [thread:$0]  (%p2770_p8), %s1193_s12, 16, %s2618_s22, %s2594_s23  }
 0x209   : > { %s1419_s20 = sshll.u32 %s1855_s28, 2  ;;  %s2773_s21 = sshll.u32 %s2051_s0, 4 }
 0x20a   : > { %s1156_s18 = sadd.s32 %s1851_s27, %s1419_s20  ;;  %s398_s14 = scalar_lea.vmem [#allocation6], %s2773_s21 }
 0x20b   : > { %s1159_s15 = sshll.u32 %s398_s14, 4  ;;  %s1420_s10 = sshll.u32 %s1156_s18, 7  ;;  %s2644_s15 = int_to_ptr.vmem [resolvable:$true] %s1159_s15 }
 0x20c   : > { %s2649_s9 = scalar_lea.hbm %s2710_s5, %s1420_s10  ;;  %s1137_s28 = scalar_lea.sflag [#allocation5], %s2051_s0 }
 0x20d   : > { %s1765_s27 = scalar_lea.vmem %s2644_s15, 256  ;;  %s1877_s23 = smov [#allocation6]  }
 0x20e   : > { %p1766_p0 = scmp.ne.s32.totalorder %s2644_s15, %s1765_s27  ;;  %s1769_s22 = sshll.u32 %s1877_s23, 4  ;;  %s1770_s22 = int_to_ptr.vmem [resolvable:$false] %s1769_s22 }
 0x20f   : > { %s1771_s12 = scalar_lea.vmem %s1770_s22, 512  ;;  %p1772_p5 = scmp.lt.s32.totalorder %s2644_s15, %s1770_s22 }
 0x210   : > { %p1767_p1 = pnand %p1766_p0, %p2770_p8  ;;  %p1773_p2 = scmp.lt.s32.totalorder %s1771_s12, %s1765_s27 }
 0x212   : > { %p1768_p4 = pneg %p1767_p1  ;;  %p1774_p6 = por %p1773_p2, %p1772_p5 }
 0x214   : > { %p1775_p7 = pnand %p1774_p6, %p1768_p4 }
 0x288   : > { %v1509_v6 = vpop.f32.mrb[0].mxu1 }
 0x289   : > { %969 = vst [vmem:[%s398_s14 + $0x8] sm:$0xff] %v1509_v6  ;;  %v959_v2 = vpop.f32.mrb[1].mxu1 }
 0x28a   : > { %968 = vst [vmem:[%s398_s14] sm:$0xff] %v959_v2 }
 0x28b   : > { %1778 = shalt.err (!%p1775_p7)
}
 0x28c   : > { %s1779_s17 = scalar_lea.hbm %s2649_s9, 256  ;;  %s1783_s18 = scalar_lea.hbm %s2710_s5, 1024 }
 0x28d   : > { %p1780_p3 = scmp.ne.s32.totalorder %s2649_s9, %s1779_s17  ;;  %p1784_p10 = scmp.lt.u32.totalorder %s2649_s9, %s2710_s5 }
 0x28e   : > { %p1785_p11 = scmp.lt.u32.totalorder %s1783_s18, %s1779_s17  ;;  %p1787_p0 = scmp.lt.u32.totalorder %s1779_s17, %s2649_s9 }
 0x28f   : > { %p1781_p9 = pnand %p1780_p3, %p2770_p8 }
 0x290   : > { %p1786_p13 = por %p1785_p11, %p1784_p10 }
 0x291   : > { %p1782_p12 = pneg %p1781_p9 }
 0x292   : > { %p1788_p1 = por %p1787_p0, %p1786_p13 }
 0x294   : > { %p1789_p4 = pnand %p1788_p1, %p1782_p12 }
 0x296   : > { %1792 = shalt.err (!%p1789_p4)
}
 0x297   : > { %s1878_s10 = smov 128   ;;  %s1879_s11 = smov 256  }
 0x298   : > { %s1880_s19 = smov 8  }
 0x299   : > { %1544 = dma.vmem_to_hbm [thread:$0]  (%p2770_p8), %s2644_s15, 256, %s2649_s9, %s1137_s28, %s1878_s10, %s1879_s11, %s1880_s19  }
 0x29a PF: > { %s2774_s27 = sld [smem:[#allocation15_spill]]  ;;  %p1560_p5 = scmp.ge.s32.totalorder %s1867_s8, 2 }
 0x29b   : > { %s1204_s23 = sand.u32 1, %s1839_s24  }
 0x29c   : > { %s1205_s22 = scalar_lea.sflag [#allocation5], %s1204_s23 }
 0x2a0   : > { %p2775_p2 = scmp.ne.s32.totalorder %s2774_s27, 0 }
 0x2a2   : > { %p1551_p6 = pnand %p1560_p5, %p2775_p2 }
 0x2a4   : > { %1830 = dma.done.wait (!%p1551_p6), %s1205_s22, 256  }
 0x2a5   : > { %1832 = vsyncadd (!%p1551_p6), %s1205_s22, 4294967040  ;;  %s2776_s12 = sadd.s32 4294967294, %s1867_s8  }
 0x2a6   : > { %s1213_s17 = sand.u32 1, %s2776_s12  }
 0x2a7   : > { %s1214_s13 = scalar_lea.sflag [#allocation8], %s1213_s17 }
 0x2a8   : > { %1834 = dma.done.wait (!%p1551_p6), %s1214_s13, 32  }
 0x2a9   : > { %1836 = vsyncadd (!%p1551_p6), %s1214_s13, 4294967264  ;;  %s27_s8 = sadd.s32 1, %s1867_s8   ;;  %s2777_s16 = sld [smem:[#allocation16_spill]] }
 0x2aa   : > { %p24_p8 = scmp.ge.s32.totalorder %s27_s8, 6   ;;  %s2778_s0 = sld [smem:[#allocation13_spill]] }
 0x2ab   : > { %s2779_s15 = sld [smem:[#allocation14_spill]]  ;;  %s2780_s24 = smov %s1843_s25 }
 0x2ac   : > { %s2781_s25 = smov %s1847_s26  ;;  %s2783_s27 = smov %s1859_s29 }
 0x2ad   : > { %s2784_s28 = smov %s1863_s30  ;;  %26 = sbr.rel (!%p24_p8) target bundleno = 11 (0xb), region = 166 }
 0x2af   : > { %s2782_s26 = smov %s2777_s16 }
 0x2b0   : > { %s2785_s29 = smov %s2778_s0 }
 0x2b1   : > { %s2786_s30 = smov %s2779_s15 }
 0x2b4   :  { %1226 = vsyncpa [#allocation4], 1 }
 0x2b5   :  { %1228 = vsyncpa [#allocation4 + $0x1], 1 }
 0x2b6   :  { %1229 = vsyncpa [#allocation5], 1 }
 0x2b7   :  { %1231 = vsyncpa [#allocation5 + $0x1], 1 }
 0x2b8   :  { %1232 = vsyncpa [#allocation8], 1 }
 0x2b9   :  { %1234 = vsyncpa [#allocation8 + $0x1], 1 }

</bundles_post_ra>
